<compile_context>
chip_gen: v6e
topology: v6e:2x2x1
jax: 0.10.0
libtpu: 0.0.40
codegen_flags: <defaults>
</compile_context>

<pallas_src>
import functools

import jax
import jax.numpy as jnp
from jax.experimental import pallas as pl
from jax.experimental.pallas import tpu as pltpu

GAMMA = 1e-10


def _bpr_loss_kernel(pos_ref, neg_ref, out_ref, *, gamma, row_tile, col_tile):
    """Per-tile -log(gamma + sigmoid(pos - neg)), folded to an (8,128) partial sum."""
    j = pl.program_id(1)  # column (reduction) axis

    @pl.when(j == 0)
    def _():
        out_ref[...] = jnp.zeros_like(out_ref)

    # Upcast inside the kernel (no-op for f32 inputs, halves HBM traffic for bf16).
    pos = pos_ref[...].astype(jnp.float32)
    neg = neg_ref[...].astype(jnp.float32)
    val = -jnp.log(gamma + jax.nn.sigmoid(pos - neg))  # (row_tile, col_tile) f32

    # Fold sublane-tile row groups: aligned (8, col_tile) slabs, pure VPU adds.
    part = val[0:8, :]
    for r in range(1, row_tile // 8):
        part = part + val[r * 8:(r + 1) * 8, :]

    # Fold lane-tile column groups: aligned (8, 128) slabs, pure VPU adds.
    acc = part[:, 0:128]
    for c in range(1, col_tile // 128):
        acc = acc + part[:, c * 128:(c + 1) * 128]

    out_ref[...] += acc  # stays resident in VMEM across the column axis


def _pick_tile(dim, preferences):
    for p in preferences:
        if p <= dim and dim % p == 0:
            return p
    return dim


def bpr_loss(pos_score, neg_score, *, gamma=GAMMA, row_tile=None, col_tile=None):
    """BPR loss: -mean(log(gamma + sigmoid(pos_score - neg_score))).

    pos_score, neg_score: [rows, cols] float arrays (any float dtype),
    rows % 8 == 0 and cols % 128 == 0.
    """
    assert pos_score.shape == neg_score.shape
    assert pos_score.ndim == 2
    rows, cols = pos_score.shape
    assert rows % 8 == 0, "rows must be a multiple of 8"
    assert cols % 128 == 0, "cols must be a multiple of 128"

    # Per-input f32-equivalent tile of ~0.5-2 MiB: good HBM-roofline fraction
    # while 2 inputs x 2 pipeline buffers fit every generation's default
    # scoped VMEM (v5e 16 MiB, v6e/v7x 32 MiB) without raising vmem_limit_bytes.
    row_tile = row_tile or _pick_tile(rows, (512, 256, 128, 64, 32, 16, 8))
    col_tile = col_tile or _pick_tile(cols, (1024, 512, 256, 128))
    assert rows % row_tile == 0 and row_tile % 8 == 0
    assert cols % col_tile == 0 and col_tile % 128 == 0

    n_row_blocks = rows // row_tile
    n_col_blocks = cols // col_tile

    kernel = functools.partial(
        _bpr_loss_kernel, gamma=gamma, row_tile=row_tile, col_tile=col_tile
    )

    partials = pl.pallas_call(
        kernel,
        out_shape=jax.ShapeDtypeStruct((n_row_blocks * 8, 128), jnp.float32),
        grid_spec=pltpu.PrefetchScalarGridSpec(
            num_scalar_prefetch=0,
            grid=(n_row_blocks, n_col_blocks),
            in_specs=[
                pl.BlockSpec((row_tile, col_tile), lambda i, j: (i, j)),
                pl.BlockSpec((row_tile, col_tile), lambda i, j: (i, j)),
            ],
            out_specs=pl.BlockSpec((8, 128), lambda i, j: (i, 0)),
        ),
        compiler_params=pltpu.CompilerParams(
            # row blocks independent (megacore / v7x 2-TC sharding),
            # column blocks = in-kernel accumulation axis, kept last.
            dimension_semantics=("parallel", "arbitrary"),
        ),
    )(pos_score, neg_score)

    inv_total = 1.0 / float(rows * cols)
    return jnp.sum(partials) * inv_total


def bpr_loss_ref(pos_score, neg_score, gamma=GAMMA):
    pos_score = pos_score.astype(jnp.float32)
    neg_score = neg_score.astype(jnp.float32)
    return -jnp.mean(jnp.log(gamma + jax.nn.sigmoid(pos_score - neg_score)))


if __name__ == "__main__":
    key = jax.random.PRNGKey(0)
    k1, k2 = jax.random.split(key)

    # Small example: 128 "users" x 1024 (pos, neg) score pairs.
    pos = jax.random.normal(k1, (128, 1024), dtype=jnp.float32)
    neg = jax.random.normal(k2, (128, 1024), dtype=jnp.float32)

    # Forced small tiles -> exercises a multi-block (parallel rows x reduction
    # cols) grid with cross-step accumulation.
    loss = bpr_loss(pos, neg, row_tile=32, col_tile=256)
    jax.block_until_ready(loss)
    ref = bpr_loss_ref(pos, neg)
    assert jnp.allclose(loss, ref, rtol=1e-5, atol=1e-5), (loss, ref)

    # Auto tile selection + native bf16 inputs (upcast inside the kernel).
    pos16 = pos.astype(jnp.bfloat16)
    neg16 = neg.astype(jnp.bfloat16)
    loss16 = bpr_loss(pos16, neg16)
    jax.block_until_ready(loss16)
    ref16 = bpr_loss_ref(pos16, neg16)
    assert jnp.allclose(loss16, ref16, rtol=1e-3, atol=1e-3), (loss16, ref16)

    print("KERNEL_OK")
</pallas_src>

<mosaic_0001>
module attributes {stable_mosaic.version = 11 : i64} {
  func.func @_bpr_loss_kernel(%arg0: i32, %arg1: i32, %arg2: memref<32x256xf32, #tpu.memory_space<vmem>>, %arg3: memref<32x256xf32, #tpu.memory_space<vmem>>, %arg4: memref<8x128xf32, #tpu.memory_space<vmem>>) attributes {dimension_semantics = [#tpu.dimension_semantics<parallel>, #tpu.dimension_semantics<arbitrary>], iteration_bounds = array<i64: 4, 4>, scalar_prefetch = 0 : i64, scratch_operands = 0 : i64, tpu.core_type = #tpu.core_type<tc>, window_params = [{transform_indices = @transform_0, window_bounds = array<i64: 32, 256>}, {transform_indices = @transform_1, window_bounds = array<i64: 32, 256>}, {transform_indices = @transform_2, window_bounds = array<i64: 8, 128>}]} {
    %c0_i32 = arith.constant 0 : i32
    %0 = arith.cmpi eq, %arg1, %c0_i32 : i32
    %1 = arith.extui %0 : i1 to i32
    %c0_i32_0 = arith.constant 0 : i32
    %2 = arith.cmpi ne, %1, %c0_i32_0 : i32
    scf.if %2 {
      %cst_10 = arith.constant 0.000000e+00 : f32
      %29 = vector.broadcast %cst_10 : f32 to vector<8x128xf32>
      %c0_11 = arith.constant 0 : index
      %c0_12 = arith.constant 0 : index
      %30 = vector.load %arg4[%c0_11, %c0_12] : memref<8x128xf32, #tpu.memory_space<vmem>>, vector<8x128xf32>
      tpu.vector_store %arg4[%c0_11, %c0_12], %29 {strides = array<i32>} : memref<8x128xf32, #tpu.memory_space<vmem>>, vector<8x128xf32>,
    } else {
    }
    %c0 = arith.constant 0 : index
    %c0_1 = arith.constant 0 : index
    %3 = vector.load %arg2[%c0, %c0_1] : memref<32x256xf32, #tpu.memory_space<vmem>>, vector<32x256xf32>
    %c0_2 = arith.constant 0 : index
    %c0_3 = arith.constant 0 : index
    %4 = vector.load %arg3[%c0_2, %c0_3] : memref<32x256xf32, #tpu.memory_space<vmem>>, vector<32x256xf32>
    %5 = arith.subf %3, %4 : vector<32x256xf32>
    %6 = arith.negf %5 : vector<32x256xf32>
    %7 = math.exp %6 : vector<32x256xf32>
    %cst = arith.constant 1.000000e+00 : f32
    %8 = vector.broadcast %cst : f32 to vector<32x256xf32>
    %9 = arith.addf %8, %7 : vector<32x256xf32>
    %10 = arith.divf %8, %9 : vector<32x256xf32>
    %cst_4 = arith.constant 1.000000e-10 : f32
    %11 = vector.broadcast %cst_4 : f32 to vector<32x256xf32>
    %12 = arith.addf %11, %10 : vector<32x256xf32>
    %13 = math.log %12 : vector<32x256xf32>
    %cst_5 = arith.constant 0.000000e+00 : f32
    %14 = vector.broadcast %cst_5 : f32 to vector<32x256xf32>
    %15 = arith.subf %14, %13 : vector<32x256xf32>
    %16 = vector.extract_strided_slice %15 {offsets = [0, 0], sizes = [8, 256], strides = [1, 1]} : vector<32x256xf32> to vector<8x256xf32>
    %17 = vector.extract_strided_slice %15 {offsets = [8, 0], sizes = [8, 256], strides = [1, 1]} : vector<32x256xf32> to vector<8x256xf32>
    %18 = arith.addf %16, %17 : vector<8x256xf32>
    %19 = vector.extract_strided_slice %15 {offsets = [16, 0], sizes = [8, 256], strides = [1, 1]} : vector<32x256xf32> to vector<8x256xf32>
    %20 = arith.addf %18, %19 : vector<8x256xf32>
    %21 = vector.extract_strided_slice %15 {offsets = [24, 0], sizes = [8, 256], strides = [1, 1]} : vector<32x256xf32> to vector<8x256xf32>
    %22 = arith.addf %20, %21 : vector<8x256xf32>
    %23 = vector.extract_strided_slice %22 {offsets = [0, 0], sizes = [8, 128], strides = [1, 1]} : vector<8x256xf32> to vector<8x128xf32>
    %24 = vector.extract_strided_slice %22 {offsets = [0, 128], sizes = [8, 128], strides = [1, 1]} : vector<8x256xf32> to vector<8x128xf32>
    %25 = arith.addf %23, %24 : vector<8x128xf32>
    %c0_6 = arith.constant 0 : index
    %c0_7 = arith.constant 0 : index
    %26 = vector.load %arg4[%c0_6, %c0_7] : memref<8x128xf32, #tpu.memory_space<vmem>>, vector<8x128xf32>
    %27 = arith.addf %26, %25 : vector<8x128xf32>
    %c0_8 = arith.constant 0 : index
    %c0_9 = arith.constant 0 : index
    %28 = vector.load %arg4[%c0_8, %c0_9] : memref<8x128xf32, #tpu.memory_space<vmem>>, vector<8x128xf32>
    tpu.vector_store %arg4[%c0_8, %c0_9], %27 {strides = array<i32>} : memref<8x128xf32, #tpu.memory_space<vmem>>, vector<8x128xf32>,
    return
  }
  func.func @transform_0(%arg0: i32, %arg1: i32) -> (i32, i32) {
    %c0_i32 = arith.constant 0 : i32
    return %arg0, %arg1 : i32, i32
  }
  func.func @transform_1(%arg0: i32, %arg1: i32) -> (i32, i32) {
    %c0_i32 = arith.constant 0 : i32
    return %arg0, %arg1 : i32, i32
  }
  func.func @transform_2(%arg0: i32, %arg1: i32) -> (i32, i32) {
    %c0_i32 = arith.constant 0 : i32
    %c0_i32_0 = arith.constant 0 : i32
    return %arg0, %c0_i32 : i32, i32
  }
}

</mosaic_0001>

<bundles_post_ra>
// kernel: tpu_custom_call.1
= control target key start
LH: loop header
LB: loop body
LE: loop exit
PB: predicated region body
PF: predicated region fallthrough
CT: control target
= control target key end

     0   :  { %s1089_s0 = inlined_call_operand.hbm [shape: f32[128,1024], index: 0, kind: input, shape index: {}]   ;;  %s1090_s1 = inlined_call_operand.hbm [shape: f32[128,1024], index: 1, kind: input, shape index: {}]   ;;  %s1091_s2 = inlined_call_operand.hbm [shape: f32[32,128], index: 2, kind: output, shape index: {}]  }
   0x1   :  { %1098 = sst [smem:[#allocation17_spill]] %s1089_s0 }
   0x2   :  { %7 = vsyncpa [#allocation3], 0 }
   0x3   :  { %9 = vsyncpa [#allocation3 + $0x1], 0 }
   0x4   :  { %10 = vsyncpa [#allocation6], 0 }
   0x5   :  { %12 = vsyncpa [#allocation6 + $0x1], 0 }
   0x6   :  { %13 = vsyncpa [#allocation4], 0 }
   0x7   :  { %15 = vsyncpa [#allocation4 + $0x1], 0  ;;  %s867_s9 = smov 0   ;;  %s869_s10 = smov 0  }
   0x8   :  { %s871_s11 = smov 0   ;;  %s873_s12 = smov 0  }
   0x9   :  { %s875_s13 = smov 0   ;;  %s877_s14 = smov 0  }
   0xa   :  { %s879_s15 = smov 0   ;;  %s881_s16 = smov 0  }
   0xb   :  { %s883_s17 = smov 0   ;;  %s885_s18 = smov 0  }
   0xc   :  { %s887_s19 = smov 0  }
   0xd LB: > { %1099 = sst [smem:[#allocation11_spill]] %s823_s14  ;;  %s471_s20 = sadd.s32 4294967295, %s843_s19   ;;  %s843_s19 = sphi %s887_s19, %s21_s19   ;;  %s839_s18 = sphi %s885_s18, %s1118_s18   ;;  %s835_s17 = sphi %s883_s17, %s1117_s17   ;;  %s831_s16 = sphi %s881_s16, %s1116_s16   ;;  %s827_s15 = sphi %s879_s15, %s1115_s15   ;;  %s823_s14 = sphi %s877_s14, %s1114_s14   ;;  %s819_s13 = sphi %s875_s13, %s1123_s13   ;;  %s815_s12 = sphi %s873_s12, %s1122_s12   ;;  %s811_s11 = sphi %s871_s11, %s1121_s11   ;;  %s807_s10 = sphi %s869_s10, %s1120_s10   ;;  %s803_s9 = sphi %s867_s9, %s1119_s9  }
   0xe   : > { %1100 = sst [smem:[#allocation12_spill]] %s835_s17  ;;  %s472_s21 = sadd.s32 4294967294, %s843_s19  }
   0xf   : > { %1101 = sst [smem:[#allocation13_spill]] %s839_s18  ;;  %s30_s22 = sadd.s32 1, %s835_s17 }
  0x10   : > { %s33_s23 = sadd.s32 1, %s839_s18  ;;  %p31_p0 = scmp.ge.s32.totalorder %s30_s22, 4 }
  0x11   : > { %s42_s24 = sadd.s32 1, %s823_s14  ;;  %p49_p1 = scmp.ne.s32.totalorder %s823_s14, %s819_s13 }
  0x12   : > { %p50_p2 = scmp.eq.s32.totalorder %s843_s19, 0  ;;  %s1125_s22 = smov (%p31_p0, %s30_s22), 0 }
  0x13   : > { %1102 = sst [smem:[#allocation14_spill]] %s1125_s22  ;;  %s1127_s23 = smov (!%p31_p0, %s33_s23), %s839_s18 }
  0x14   : > { %s38_s25 = ssub.s32 %s835_s17, %s1125_s22  ;;  %p933_p3 = por %p50_p2, %p49_p1 }
  0x15   : > { %p35_p4 = scmp.ge.s32.totalorder %s1127_s23, 4  ;;  %p55_p5 = scmp.ne.s32.totalorder %s819_s13, %s815_s12 }
  0x16   : > { %p56_p6 = scmp.eq.s32.totalorder %s471_s20, 0  ;;  %s96_s27 = sadd.s32 1, %s811_s11 }
  0x17   : > { %s1129_s23 = smov (%p35_p4, %s1127_s23), 0  ;;  %p106_p8 = scmp.ne.s32.totalorder %s811_s11, %s807_s10 }
  0x18   : > { %1104 = sst [smem:[#allocation15_spill]] %s1129_s23  ;;  %p941_p7 = por %p56_p6, %p55_p5 }
  0x19   : > { %s37_s29 = ssub.s32 %s839_s18, %s1129_s23  ;;  %p107_p9 = scmp.eq.s32.totalorder %s471_s20, 15 }
  0x1a   : > { %s39_s30 = sor.u32 %s38_s25, %s37_s29  ;;  %p94_p10 = scmp.eq.s32.totalorder %s37_s29, 0 }
  0x1b   : > { %p40_p11 = scmp.eq.s32.totalorder %s39_s30, 0  ;;  %p949_p12 = por %p107_p9, %p106_p8 }
  0x1c   : > { %s954_s4 = scalar_select %p94_p10, %s811_s11, %s96_s27  }
  0x1d   : > { %s957_s5 = scalar_select %p40_p11, %s823_s14, %s42_s24  }
  0x1e   : > { %p112_p13 = scmp.ne.s32.totalorder %s807_s10, %s803_s9  ;;  %p113_p0 = scmp.eq.s32.totalorder %s472_s21, 15 }
  0x1f   : > { %1107 = sst [smem:[#allocation16_spill]] %s957_s5  ;;  %p521_p1 = scmp.lt.s32.totalorder %s843_s19, 16 }
  0x20   : > { %p962_p2 = por %p113_p0, %p112_p13  ;;  %s967_s7 = sand.u32 1, %s823_s14  }
  0x21   : > { %s1095_s8 = sshll.u32 %s967_s7, 6  ;;  %s477_s12 = sshll.u32 %s835_s17, 1 }
  0x22   : > { %s502_s20 = sshll.u32 %s839_s18, 5  ;;  %s137_s25 = scalar_lea.vmem [#allocation2], %s1095_s8 }
  0x23   : > { %s147_s24 = sshll.u32 %s137_s25, 4  ;;  %s974_s27 = sadd.s32 %s502_s20, %s477_s12  ;;  %s148_s24 = int_to_ptr.vmem [resolvable:$true] %s147_s24 }
  0x24   : > { %s479_s21 = sshll.u32 %s974_s27, 7  ;;  %p979_p4 = pnand %p521_p1, %p933_p3 }
  0x25   : > { %s1110_s0 = sld [smem:[#allocation17_spill]]  ;;  %p485_p5 = scmp.ge.s32.totalorder %s843_s19, 1 }
  0x26   : > { %s134_s18 = scalar_lea.sflag [#allocation3], %s967_s7  ;;  %p665_p6 = pneg %p979_p4 }
  0x27   : > { %s676_s12 = scalar_lea.vmem %s148_s24, 1024  ;;  %s845_s26 = smov [#allocation2]  }
  0x28   : > { %p677_p8 = scmp.ne.s32.totalorder %s148_s24, %s676_s12  ;;  %s681_s20 = sshll.u32 %s845_s26, 4  ;;  %s682_s20 = int_to_ptr.vmem [resolvable:$false] %s681_s20 }
  0x29   : > { %s683_s25 = scalar_lea.vmem %s682_s20, 2048  ;;  %p684_p3 = scmp.lt.s32.totalorder %s148_s24, %s682_s20 }
  0x2a   : > { %p679_p9 = pnand %p677_p8, %p665_p6  ;;  %p685_p11 = scmp.lt.s32.totalorder %s683_s25, %s676_s12 }
  0x2b   : > { %s146_s22 = scalar_lea.hbm %s1110_s0, %s479_s21 }
  0x2c   : > { %p680_p10 = pneg %p679_p9  ;;  %p686_p13 = por %p685_p11, %p684_p3 }
  0x2e   : > { %p687_p0 = pnand %p686_p13, %p680_p10 }
  0x30   : > { %690 = shalt.err (!%p687_p0)
}
  0x31   : > { %s846_s23 = smov 1024   ;;  %s847_s27 = smov 256  }
  0x32   : > { %s848_s30 = smov 16   ;;  %p179_p1 = scmp.lt.s32.totalorder %s843_s19, 17 }
  0x33   : > { %513 = dma.hbm_to_vmem [thread:$0]  (!%p979_p4), %s146_s22, 1024, %s148_s24, %s134_s18, %s846_s23, %s847_s27, %s848_s30  }
  0x34   : > { %s170_s20 = scalar_lea.hbm %s1090_s1, %s479_s21  ;;  %p1001_p8 = pnand %p485_p5, %p179_p1 }
  0x35   : > { %s1112_s25 = sshll.u32 %s967_s7, 6  ;;  %s158_s5 = scalar_lea.sflag [#allocation6], %s967_s7 }
  0x36   : > { %s161_s0 = scalar_lea.vmem [#allocation5], %s1112_s25  ;;  %s849_s18 = smov [#allocation5]  }
  0x37   : > { %s171_s17 = sshll.u32 %s161_s0, 4  ;;  %s709_s22 = sshll.u32 %s849_s18, 4  ;;  %s172_s17 = int_to_ptr.vmem [resolvable:$true] %s171_s17  ;;  %s710_s22 = int_to_ptr.vmem [resolvable:$false] %s709_s22 }
  0x38   : > { %s704_s14 = scalar_lea.vmem %s172_s17, 1024  ;;  %s711_s8 = scalar_lea.vmem %s710_s22, 2048 }
  0x39   : > { %p705_p9 = scmp.ne.s32.totalorder %s172_s17, %s704_s14  ;;  %p712_p11 = scmp.lt.s32.totalorder %s172_s17, %s710_s22 }
  0x3a   : > { %p713_p5 = scmp.lt.s32.totalorder %s711_s8, %s704_s14 }
  0x3b   : > { %p707_p10 = pnand %p705_p9, %p665_p6 }
  0x3c   : > { %p714_p13 = por %p713_p5, %p712_p11 }
  0x3d   : > { %p708_p3 = pneg %p707_p10 }
  0x3f   : > { %p715_p0 = pnand %p714_p13, %p708_p3 }
  0x41   : > { %718 = shalt.err (!%p715_p0)
}
  0x42   : > { %516 = dma.hbm_to_vmem [thread:$0]  (!%p979_p4), %s170_s20, 1024, %s172_s17, %s158_s5, %s846_s23, %s847_s27, %s848_s30  }
  0x43   : > { %183 = sbr.rel (%p1001_p8) target bundleno = 167 (0xa7), region = 28  ;;  %s185_s0 = sand.u32 (!%p1001_p8), 1, %s819_s13  }
  0x44   : > { %s486_s7 = sshll.u32 (!%p1001_p8), %s185_s0, 6  ;;  %s186_s24 = scalar_lea.sflag (!%p1001_p8), [#allocation3], %s185_s0 }
  0x45   : > { %s189_s21 = scalar_lea.vmem (!%p1001_p8), [#allocation2], %s486_s7 }
  0x48   : > { %790 = dma.done.wait (%p941_p7), %s186_s24, 1024  }
  0x49   : > { %792 = vsyncadd (%p941_p7), %s186_s24, 4294966272  ;;  %s195_s14 = scalar_lea.sflag [#allocation6], %s185_s0  ;;  %s198_s26 = scalar_lea.vmem [#allocation5], %s486_s7 }
  0x4a   : > { %794 = dma.done.wait (%p941_p7), %s195_s14, 1024  }
  0x4b   : > { %796 = vsyncadd (%p941_p7), %s195_s14, 4294966272  ;;  %s221_s17 = sand.u32 1, %s807_s10   ;;  %p489_p4 = scmp.ne.s32.totalorder %s827_s15, 0 }
  0x4c   : > { %s488_s5 = sshll.u32 %s221_s17, 3 }
  0x4d   : > { %s1027_s29 = scalar_lea.vmem [#allocation7], %s488_s5  ;;  %231 = sbr.rel (%p489_p4) target bundleno = 84 (0x54), region = 40 }
  0x52   : > { %v850_v0 = vmov 0.0  }
  0x53   : > { %232 = vst [vmem:[%s1027_s29] sm:$0xff] %v850_v0 }
  0x54 PF: > { %v233_v1 = vld [vmem:[%s189_s21] sm:$0xff]  ;;  %v234_v2 = vld [vmem:[%s189_s21 + $0x8] sm:$0xff]  ;;  %v235_v3 = vld [vmem:[%s189_s21 + $0x10] sm:$0xff]  ;;  %s499_s15 = sshll.u32 %s831_s16, 7  ;;  %s361_s28 = sshll.u32 %s1027_s29, 4  ;;  %s362_s28 = int_to_ptr.vmem [resolvable:$true] %s361_s28 }
  0x55   : > { %v236_v4 = vld [vmem:[%s189_s21 + $0x18] sm:$0xff]  ;;  %v237_v5 = vld [vmem:[%s189_s21 + $0x20] sm:$0xff]  ;;  %v238_v6 = vld [vmem:[%s189_s21 + $0x28] sm:$0xff]  ;;  %s359_s30 = scalar_lea.hbm %s1091_s2, %s499_s15  ;;  %s348_s20 = scalar_lea.sflag [#allocation4], %s221_s17 }
  0x56   : > { %v239_v7 = vld [vmem:[%s189_s21 + $0x30] sm:$0xff]  ;;  %v240_v8 = vld [vmem:[%s189_s21 + $0x38] sm:$0xff]  ;;  %v241_v9 = vld [vmem:[%s198_s26] sm:$0xff]  ;;  %s719_s12 = scalar_lea.vmem %s362_s28, 128  ;;  %s851_s25 = smov [#allocation7]  }
  0x57   : > { %v242_v10 = vld [vmem:[%s198_s26 + $0x8] sm:$0xff]  ;;  %v243_v11 = vld [vmem:[%s198_s26 + $0x10] sm:$0xff]  ;;  %v244_v12 = vld [vmem:[%s198_s26 + $0x18] sm:$0xff]  ;;  %v249_v13 = vsub.f32 %v233_v1, %v241_v9  ;;  %p720_p7 = scmp.ne.s32.totalorder %s362_s28, %s719_s12  ;;  %s723_s18 = sshll.u32 %s851_s25, 4  ;;  %s724_s18 = int_to_ptr.vmem [resolvable:$false] %s723_s18 }
  0x58   : > { %v245_v14 = vld [vmem:[%s198_s26 + $0x20] sm:$0xff]  ;;  %v246_v15 = vld [vmem:[%s198_s26 + $0x28] sm:$0xff]  ;;  %v247_v16 = vld [vmem:[%s198_s26 + $0x30] sm:$0xff]  ;;  %v250_v17 = vsub.f32 %v234_v2, %v242_v10  ;;  %v251_v18 = vsub.f32 %v235_v3, %v243_v11  ;;  %v252_v19 = vsub.f32 %v236_v4, %v244_v12  ;;  %s725_s16 = scalar_lea.vmem %s724_s18, 256  ;;  %p726_p8 = scmp.lt.s32.totalorder %s362_s28, %s724_s18 }
  0x59   : > { %v248_v20 = vld [vmem:[%s198_s26 + $0x38] sm:$0xff]  ;;  %v253_v21 = vsub.f32 %v237_v5, %v245_v14  ;;  %v254_v22 = vsub.f32 %v238_v6, %v246_v15  ;;  %v255_v23 = vsub.f32 %v239_v7, %v247_v16  ;;  %v490_v24 = vmul.f32 -1.442695, %v249_v13  ;;  %p721_p6 = pnand %p720_p7, %p949_p12  ;;  %p727_p9 = scmp.lt.s32.totalorder %s725_s16, %s719_s12 }
  0x5a   : > { %v256_v25 = vsub.f32 %v240_v8, %v248_v20  ;;  %v491_v26 = vmul.f32 -1.442695, %v250_v17  ;;  %v492_v27 = vmul.f32 -1.442695, %v251_v18  ;;  %v493_v28 = vmul.f32 -1.442695, %v252_v19 }
  0x5b   : > { %615 = vpow2.f32 %v490_v24  ;;  %v494_v29 = vmul.f32 -1.442695, %v253_v21  ;;  %v495_v30 = vmul.f32 -1.442695, %v254_v22  ;;  %v496_v31 = vmul.f32 -1.442695, %v255_v23  ;;  %p722_p1 = pneg %p721_p6  ;;  %p728_p10 = por %p727_p9, %p726_p8 }
  0x5c   : > { %617 = vpow2.f32 %v491_v26  ;;  %v497_v32 = vmul.f32 -1.442695, %v256_v25 }
  0x5d   : > { %619 = vpow2.f32 %v492_v27  ;;  %p729_p3 = pnand %p728_p10, %p722_p1 }
  0x5e   : > { %621 = vpow2.f32 %v493_v28 }
  0x5f   : > { %623 = vpow2.f32 %v494_v29 }
  0x60   : > { %625 = vpow2.f32 %v495_v30 }
  0x61   : > { %627 = vpow2.f32 %v496_v31  ;;  %v344_v31 = vld [vmem:[%s1027_s29] sm:$0xff] }
  0x62   : > { %629 = vpow2.f32 %v497_v32 }
  0x68   : > { %v616_v33 = vpop.eup %615 }
  0x69   : > { %v618_v34 = vpop.eup %617  ;;  %v281_v35 = vadd.f32 1.0, %v616_v33 }
  0x6a   : > { %v620_v36 = vpop.eup %619  ;;  %v282_v37 = vadd.f32 1.0, %v618_v34 }
  0x6b   : > { %v622_v38 = vpop.eup %621  ;;  %v283_v39 = vadd.f32 1.0, %v620_v36  ;;  %631 = vrcp.f32 %v281_v35 }
  0x6c   : > { %v624_v40 = vpop.eup %623  ;;  %v284_v41 = vadd.f32 1.0, %v622_v38  ;;  %633 = vrcp.f32 %v282_v37 }
  0x6d   : > { %v626_v42 = vpop.eup %625  ;;  %v285_v43 = vadd.f32 1.0, %v624_v40  ;;  %635 = vrcp.f32 %v283_v39 }
  0x6e   : > { %v628_v44 = vpop.eup %627  ;;  %v286_v45 = vadd.f32 1.0, %v626_v42  ;;  %637 = vrcp.f32 %v284_v41 }
  0x6f   : > { %v630_v46 = vpop.eup %629  ;;  %v287_v47 = vadd.f32 1.0, %v628_v44  ;;  %639 = vrcp.f32 %v285_v43 }
  0x70   : > { %v288_v48 = vadd.f32 1.0, %v630_v46  ;;  %641 = vrcp.f32 %v286_v45 }
  0x71   : > { %643 = vrcp.f32 %v287_v47 }
  0x72   : > { %645 = vrcp.f32 %v288_v48 }
  0x78   : > { %v632_v49 = vpop.eup %631 }
  0x79   : > { %v634_v50 = vpop.eup %633  ;;  %v305_v51 = vadd.f32 1e-10, %v632_v49 }
  0x7a   : > { %v636_v52 = vpop.eup %635  ;;  %v306_v53 = vadd.f32 1e-10, %v634_v50 }
  0x7b   : > { %v638_v54 = vpop.eup %637  ;;  %v307_v55 = vadd.f32 1e-10, %v636_v52  ;;  %647 = vlog2.f32 %v305_v51 }
  0x7c   : > { %v640_v56 = vpop.eup %639  ;;  %v308_v57 = vadd.f32 1e-10, %v638_v54  ;;  %649 = vlog2.f32 %v306_v53 }
  0x7d   : > { %v642_v58 = vpop.eup %641  ;;  %v309_v59 = vadd.f32 1e-10, %v640_v56  ;;  %651 = vlog2.f32 %v307_v55 }
  0x7e   : > { %v644_v60 = vpop.eup %643  ;;  %v310_v61 = vadd.f32 1e-10, %v642_v58  ;;  %653 = vlog2.f32 %v308_v57 }
  0x7f   : > { %v646_v62 = vpop.eup %645  ;;  %v311_v63 = vadd.f32 1e-10, %v644_v60  ;;  %655 = vlog2.f32 %v309_v59 }
  0x80   : > { %v312_v0 = vadd.f32 1e-10, %v646_v62  ;;  %657 = vlog2.f32 %v310_v61 }
  0x81   : > { %659 = vlog2.f32 %v311_v63 }
  0x82   : > { %661 = vlog2.f32 %v312_v0 }
  0x88   : > { %v648_v1 = vpop.eup %647 }
  0x89   : > { %v650_v2 = vpop.eup %649  ;;  %v314_v3 = vmul.f32 0.6931472, %v648_v1 }
  0x8a   : > { %v652_v4 = vpop.eup %651  ;;  %v316_v5 = vmul.f32 0.6931472, %v650_v2 }
  0x8b   : > { %v654_v6 = vpop.eup %653  ;;  %v318_v7 = vmul.f32 0.6931472, %v652_v4  ;;  %v329_v8 = vsub.f32 0.0, %v314_v3 }
  0x8c   : > { %v656_v9 = vpop.eup %655  ;;  %v320_v10 = vmul.f32 0.6931472, %v654_v6  ;;  %v330_v11 = vsub.f32 0.0, %v316_v5 }
  0x8d   : > { %v658_v12 = vpop.eup %657  ;;  %v322_v13 = vmul.f32 0.6931472, %v656_v9  ;;  %v331_v14 = vsub.f32 0.0, %v318_v7 }
  0x8e   : > { %v660_v15 = vpop.eup %659  ;;  %v324_v16 = vmul.f32 0.6931472, %v658_v12  ;;  %v332_v17 = vsub.f32 0.0, %v320_v10 }
  0x8f   : > { %v662_v18 = vpop.eup %661  ;;  %v326_v19 = vmul.f32 0.6931472, %v660_v15  ;;  %v333_v20 = vsub.f32 0.0, %v322_v13  ;;  %v337_v21 = vadd.f32 %v331_v14, %v329_v8 }
  0x90   : > { %v328_v22 = vmul.f32 0.6931472, %v662_v18  ;;  %v334_v23 = vsub.f32 0.0, %v324_v16  ;;  %v338_v24 = vadd.f32 %v332_v17, %v330_v11 }
  0x91   : > { %v335_v25 = vsub.f32 0.0, %v326_v19  ;;  %v339_v26 = vadd.f32 %v337_v21, %v333_v20 }
  0x92   : > { %v336_v27 = vsub.f32 0.0, %v328_v22  ;;  %v340_v28 = vadd.f32 %v338_v24, %v334_v23 }
  0x93   : > { %v341_v29 = vadd.f32 %v339_v26, %v335_v25 }
  0x94   : > { %v342_v30 = vadd.f32 %v340_v28, %v336_v27 }
  0x96   : > { %v343_v32 = vadd.f32 %v342_v30, %v341_v29 }
  0x98   : > { %v345_v33 = vadd.f32 %v344_v31, %v343_v32 }
  0x9a   : > { %346 = vst [vmem:[%s1027_s29] sm:$0xff] %v345_v33 }
  0x9b   : > { %732 = shalt.err (!%p729_p3)
}
  0x9c   : > { %s733_s22 = scalar_lea.hbm %s359_s30, 128  ;;  %s737_s7 = scalar_lea.hbm %s1091_s2, 512 }
  0x9d   : > { %p734_p11 = scmp.ne.s32.totalorder %s359_s30, %s733_s22  ;;  %p738_p0 = scmp.lt.s32.totalorder %s359_s30, %s1091_s2 }
  0x9e   : > { %p739_p4 = scmp.lt.s32.totalorder %s737_s7, %s733_s22 }
  0x9f   : > { %p735_p5 = pnand %p734_p11, %p949_p12 }
  0xa0   : > { %p740_p7 = por %p739_p4, %p738_p0 }
  0xa1   : > { %p736_p13 = pneg %p735_p5 }
  0xa3   : > { %p741_p6 = pnand %p740_p7, %p736_p13 }
  0xa5   : > { %744 = shalt.err (!%p741_p6)
}
  0xa6   : > { %508 = dma.vmem_to_hbm [thread:$0]  (%p949_p12), %s362_s28, 128, %s359_s30, %s348_s20  }
  0xa7 PF: > { %p522_p1 = scmp.ge.s32.totalorder %s843_s19, 2  ;;  %s373_s14 = sand.u32 1, %s803_s9  }
  0xa8   : > { %s374_s26 = scalar_lea.sflag [#allocation4], %s373_s14 }
  0xa9   : > { %p518_p8 = pnand %p522_p1, %p962_p2 }
  0xab   : > { %p519_p9 = pneg %p518_p8 }
  0xad   : > { %798 = dma.done.wait (%p519_p9), %s374_s26, 128  }
  0xae   : > { %800 = vsyncadd (%p519_p9), %s374_s26, 4294967168  ;;  %s21_s19 = sadd.s32 1, %s843_s19   ;;  %s1113_s3 = sld [smem:[#allocation11_spill]] }
  0xaf   : > { %p18_p10 = scmp.ge.s32.totalorder %s21_s19, 18   ;;  %s1114_s14 = sld [smem:[#allocation16_spill]] }
  0xb0   : > { %s1115_s15 = sld [smem:[#allocation12_spill]]  ;;  %s1119_s9 = smov %s807_s10 }
  0xb1   : > { %s1116_s16 = sld [smem:[#allocation13_spill]]  ;;  %s1120_s10 = smov %s811_s11 }
  0xb2   : > { %s1117_s17 = sld [smem:[#allocation14_spill]]  ;;  %s1121_s11 = smov %s954_s4 }
  0xb3   : > { %s1118_s18 = sld [smem:[#allocation15_spill]]  ;;  %s1122_s12 = smov %s819_s13 }
  0xb4   : > { %s1123_s13 = smov %s1113_s3  ;;  %20 = sbr.rel (!%p18_p10) target bundleno = 13 (0xd), region = 90 }
  0xb9   :  { %379 = vsyncpa [#allocation3], 1 }
  0xba   :  { %381 = vsyncpa [#allocation3 + $0x1], 1 }
  0xbb   :  { %382 = vsyncpa [#allocation6], 1 }
  0xbc   :  { %384 = vsyncpa [#allocation6 + $0x1], 1 }
  0xbd   :  { %385 = vsyncpa [#allocation4], 1 }
  0xbe   :  { %387 = vsyncpa [#allocation4 + $0x1], 1 }

</bundles_post_ra>
